<compile_context>
chip_gen: v7x
topology: tpu7x:2x2x1
jax: 0.10.0
libtpu: 0.0.40
codegen_flags: <defaults>
</compile_context>

<pallas_src>
import functools

import numpy as np
import jax
import jax.numpy as jnp
from jax import lax
from jax.experimental import pallas as pl
from jax.experimental.pallas import tpu as pltpu


# -----------------------------------------------------------------------------
# GENEO kernel construction (glue, plain NumPy).  Deterministic parameters
# stand in for geneo_class.geneo_random_config(); this is a synthetic init,
# not a checkpoint load.  The "cylinder" GENEO: Gaussian in (H, W), constant
# along D, zero-sum, scaled by sign.
# -----------------------------------------------------------------------------
def geneo_cylinder_profile(kernel_size, sigma=1.0, sign=1.0):
    kd, kh, kw = kernel_size
    ch, cw = (kh - 1) / 2.0, (kw - 1) / 2.0
    hh = np.arange(kh, dtype=np.float64)[:, None]
    ww = np.arange(kw, dtype=np.float64)[None, :]
    g = np.exp(-((hh - ch) ** 2 + (ww - cw) ** 2) / (2.0 * sigma ** 2))
    g = g / g.sum()
    g = g - g.mean()                       # zero-sum GENEO-style slice
    # TODO(synk): PyTorch uses float64 for the kernel; TPU path stays float32.
    return (sign * g / float(kd)).astype(np.float32)   # (kh, kw), depth-constant


# -----------------------------------------------------------------------------
# Pallas kernel: 3-D 'same' cross-correlation with a depth-constant (kH, kW)
# GENEO profile, on a lane-dense flattened (H*W) axis.
# -----------------------------------------------------------------------------
def _geneo_conv3d_kernel(x_ref, o_ref, pad_ref, *,
                         weights, kd, kh, kw, D, H, W, HW,
                         pd_lo, ph_lo, pw_lo):
    nb = pad_ref.shape[0]
    pd_hi = kd - 1 - pd_lo

    # ---- Depth-padded staging: zero ONLY the halo rows, then a lane-aligned,
    # full-width store of the input block into the interior rows.  The scratch
    # is rewritten every step, so it is valid for any grid-step / core order.
    if pd_lo > 0:
        pad_ref[:, pl.ds(0, pd_lo), :] = jnp.zeros((nb, pd_lo, HW), jnp.float32)
    if pd_hi > 0:
        pad_ref[:, pl.ds(pd_lo + D, pd_hi), :] = jnp.zeros((nb, pd_hi, HW), jnp.float32)
    pad_ref[:, pl.ds(pd_lo, D), :] = x_ref[...].astype(jnp.float32)

    # ---- Depth pass: the cylinder GENEO is constant along depth, so the kd
    # depth taps collapse to a running sum held in registers (kd lane-aligned,
    # sublane-offset loads; no second scratch round-trip).
    s = pad_ref[:, pl.ds(0, D), :]
    for zd in range(1, kd):
        s = s + pad_ref[:, pl.ds(zd, D), :]

    # ---- Per-tap masked weight vectors, hoisted out of the tap loop.
    # Flattened lane index f = h*W + w.  H-validity of a row shift dh is a pure
    # comparison on f (no integer divide); W-validity needs w = f mod W, which
    # is a bitwise AND for power-of-two W.
    lane = lax.broadcasted_iota(jnp.int32, (1, 1, HW), 2)
    if W & (W - 1) == 0:
        w_pos = lane & (W - 1)
    else:
        # TODO(synk): non power-of-two W takes the (less common) integer-mod path.
        w_pos = lane % W

    taps = []   # list of (flat_shift, weight_vector_or_scalar)
    for zh in range(kh):
        dh = zh - ph_lo
        if dh < 0:
            h_ok = lane >= (-dh) * W
        elif dh > 0:
            h_ok = lane < (H - dh) * W
        else:
            h_ok = None
        for zw in range(kw):
            dw = zw - pw_lo
            if dw < 0:
                w_ok = w_pos >= -dw
            elif dw > 0:
                w_ok = w_pos < (W - dw)
            else:
                w_ok = None
            if h_ok is None:
                ok = w_ok
            elif w_ok is None:
                ok = h_ok
            else:
                ok = h_ok & w_ok
            wgt = float(weights[zh][zw])
            wvec = wgt if ok is None else jnp.where(ok, wgt, 0.0)
            taps.append((dh * W + dw, wvec))

    # ---- 2-D stencil on the flattened (H*W) lane axis.  A tap shift (dh, dw)
    # is a flat shift of dh*W + dw, realized with pltpu.roll (XLU slot, not
    # vld).  Any lane that wraps around corresponds exactly to an out-of-bounds
    # tap and is zeroed by the per-tap mask folded into the weight vector.
    acc = None
    for delta, wvec in taps:
        shifted = s if delta == 0 else pltpu.roll(s, shift=(-delta) % HW, axis=2)
        term = wvec * shifted
        acc = term if acc is None else acc + term

    o_ref[...] = acc.astype(o_ref.dtype)


# -----------------------------------------------------------------------------
# Grid / block selection per chip generation.
# -----------------------------------------------------------------------------
def _num_tensorcores():
    """Best-effort TensorCores-per-chip (v7x has 2; v5e/v6e have 1)."""
    try:
        kind = jax.devices()[0].device_kind.lower()
    except Exception:
        return 1
    return 2 if ("v7" in kind or "7x" in kind) else 1


def _choose_batch_grid(n, d, hw, kd, ncores,
                       vmem_budget=10 * 1024 * 1024,
                       reg_budget=32 * 1024):
    """Smallest divisor of n whose per-step block fits a conservative VMEM
    budget (double-buffered in/out blocks + depth-padded scratch) and a
    register-pressure budget for the in-register depth sum / accumulator,
    preferring multiples of the TensorCore count so a "parallel" grid can be
    sharded across both cores on v7x.  Single-TC chips collapse to grid=1."""
    dp = d + kd - 1
    per_sample_vmem = 4 * hw * (2 * d + 2 * d + dp)
    per_sample_regs = 4 * hw * d
    divisors = [g for g in range(1, n + 1) if n % g == 0]

    def fits(g):
        nb = n // g
        return (nb * per_sample_vmem <= vmem_budget
                and nb * per_sample_regs <= reg_budget)

    for g in divisors:
        if g % ncores == 0 and fits(g):
            return g
    for g in divisors:
        if fits(g):
            return g
    return n


def geneo_conv3d_same(x_ncdhw, g2d, kd):
    """x_ncdhw: (N, 1, D, H, W); g2d: (kH, kW) depth-constant GENEO slice."""
    n, c, d, h, w = x_ncdhw.shape
    assert c == 1, "GENEO_Layer uses a single input channel"
    kh, kw = g2d.shape

    pd_lo = (kd - 1) // 2
    ph_lo = (kh - 1) // 2
    pw_lo = (kw - 1) // 2

    # Lane-dense flattened (H, W).  H*W % 128 == 0 (true for 16x16 voxel grids)
    # keeps every load/store a full unmasked vector op.
    hw = h * w
    dp = d + kd - 1

    grid_n = _choose_batch_grid(n, d, hw, kd, _num_tensorcores())
    nb = n // grid_n

    x_flat = x_ncdhw.reshape(n, d, hw).astype(jnp.float32)   # metadata-only reshape

    # Bake the (fixed, deterministic) GENEO weights as compile-time constants.
    weights = tuple(tuple(float(v) for v in row) for row in np.asarray(g2d))

    kernel_fn = functools.partial(
        _geneo_conv3d_kernel,
        weights=weights, kd=kd, kh=kh, kw=kw, D=d, H=h, W=w, HW=hw,
        pd_lo=pd_lo, ph_lo=ph_lo, pw_lo=pw_lo,
    )

    cost = pl.CostEstimate(
        flops=2 * n * d * h * w * kd * kh * kw,
        transcendentals=0,
        bytes_accessed=4 * 2 * n * d * hw,
    )

    out_flat = pl.pallas_call(
        kernel_fn,
        out_shape=jax.ShapeDtypeStruct((n, d, hw), jnp.float32),
        grid_spec=pltpu.PrefetchScalarGridSpec(
            num_scalar_prefetch=0,
            grid=(grid_n,),
            in_specs=[pl.BlockSpec((nb, d, hw), lambda b: (b, 0, 0))],
            out_specs=pl.BlockSpec((nb, d, hw), lambda b: (b, 0, 0)),
            scratch_shapes=[pltpu.VMEM((nb, dp, hw), jnp.float32)],
        ),
        compiler_params=pltpu.CompilerParams(
            dimension_semantics=("parallel",),
        ),
        cost_estimate=cost,
    )(x_flat)

    # (n, d, hw) -> (N, 1, D, H, W): pure metadata, no extra HBM pass.
    return out_flat.reshape(n, d, h, w)[:, None]


# -----------------------------------------------------------------------------
# GENEO_Layer wrapper
# -----------------------------------------------------------------------------
class GENEOLayerPallas:
    def __init__(self, kernel_size=(3, 3, 3), sigma=1.0, sign=1.0):
        self.kernel_size = kernel_size
        self.sigma = sigma
        self.sign = sign
        self._g2d = geneo_cylinder_profile(kernel_size, sigma, sign)

    def compute_kernel(self):
        kd = self.kernel_size[0]
        return jnp.asarray(np.broadcast_to(self._g2d, (kd,) + self._g2d.shape))

    def __call__(self, x):
        return geneo_conv3d_same(x, self._g2d, self.kernel_size[0])


if __name__ == "__main__":
    key = jax.random.PRNGKey(0)
    # Small NCDHW input consistent with SCENE-Net voxel grids: (N=2, C=1, D=8, H=16, W=16)
    x = jax.random.normal(key, (2, 1, 8, 16, 16), dtype=jnp.float32)

    layer = GENEOLayerPallas(kernel_size=(3, 3, 3), sigma=1.0, sign=1.0)
    y = jax.block_until_ready(layer(x))

    # Reference check against XLA's conv (cross-correlation, SAME padding).
    k = layer.compute_kernel()
    ref = lax.conv_general_dilated(
        x.astype(jnp.float32),
        k[None, None].astype(jnp.float32),   # (O=1, I=1, kD, kH, kW)
        window_strides=(1, 1, 1),
        padding="SAME",
        dimension_numbers=("NCDHW", "OIDHW", "NCDHW"),
    )
    assert y.shape == x.shape
    assert jnp.allclose(y, ref, atol=1e-4, rtol=1e-4), "mismatch vs reference conv3d"

    print("KERNEL_OK")
</pallas_src>

<mosaic_0001>
module attributes {stable_mosaic.version = 11 : i64} {
  func.func @_geneo_conv3d_kernel(%arg0: i32, %arg1: memref<2x8x256xf32, #tpu.memory_space<vmem>>, %arg2: memref<2x8x256xf32, #tpu.memory_space<vmem>>, %arg3: memref<2x10x256xf32, #tpu.memory_space<vmem>>) attributes {dimension_semantics = [#tpu.dimension_semantics<parallel>], iteration_bounds = array<i64: 1>, scalar_prefetch = 0 : i64, scratch_operands = 1 : i64, tpu.core_type = #tpu.core_type<tc>, window_params = [{transform_indices = @transform_0, window_bounds = array<i64: 2, 8, 256>}, {transform_indices = @transform_1, window_bounds = array<i64: 2, 8, 256>}]} {
    %cst = arith.constant 0.000000e+00 : f32
    %0 = vector.broadcast %cst : f32 to vector<2x1x256xf32>
    %c0 = arith.constant 0 : index
    %c0_0 = arith.constant 0 : index
    %c0_1 = arith.constant 0 : index
    %1 = vector.load %arg3[%c0, %c0_0, %c0_1] : memref<2x10x256xf32, #tpu.memory_space<vmem>>, vector<2x1x256xf32>
    tpu.vector_store %arg3[%c0, %c0_0, %c0_1], %0 {strides = array<i32>} : memref<2x10x256xf32, #tpu.memory_space<vmem>>, vector<2x1x256xf32>,
    %cst_2 = arith.constant 0.000000e+00 : f32
    %2 = vector.broadcast %cst_2 : f32 to vector<2x1x256xf32>
    %c0_3 = arith.constant 0 : index
    %c9 = arith.constant 9 : index
    %c0_4 = arith.constant 0 : index
    %3 = vector.load %arg3[%c0_3, %c9, %c0_4] : memref<2x10x256xf32, #tpu.memory_space<vmem>>, vector<2x1x256xf32>
    tpu.vector_store %arg3[%c0_3, %c9, %c0_4], %2 {strides = array<i32>} : memref<2x10x256xf32, #tpu.memory_space<vmem>>, vector<2x1x256xf32>,
    %c0_5 = arith.constant 0 : index
    %c0_6 = arith.constant 0 : index
    %c0_7 = arith.constant 0 : index
    %4 = vector.load %arg1[%c0_5, %c0_6, %c0_7] : memref<2x8x256xf32, #tpu.memory_space<vmem>>, vector<2x8x256xf32>
    %c0_8 = arith.constant 0 : index
    %c1 = arith.constant 1 : index
    %c0_9 = arith.constant 0 : index
    %5 = vector.load %arg3[%c0_8, %c1, %c0_9] : memref<2x10x256xf32, #tpu.memory_space<vmem>>, vector<2x8x256xf32>
    tpu.vector_store %arg3[%c0_8, %c1, %c0_9], %4 {strides = array<i32>} : memref<2x10x256xf32, #tpu.memory_space<vmem>>, vector<2x8x256xf32>,
    %c0_10 = arith.constant 0 : index
    %c0_11 = arith.constant 0 : index
    %c0_12 = arith.constant 0 : index
    %6 = vector.load %arg3[%c0_10, %c0_11, %c0_12] : memref<2x10x256xf32, #tpu.memory_space<vmem>>, vector<2x8x256xf32>
    %c0_13 = arith.constant 0 : index
    %c1_14 = arith.constant 1 : index
    %c0_15 = arith.constant 0 : index
    %7 = vector.load %arg3[%c0_13, %c1_14, %c0_15] : memref<2x10x256xf32, #tpu.memory_space<vmem>>, vector<2x8x256xf32>
    %8 = arith.addf %6, %7 : vector<2x8x256xf32>
    %c0_16 = arith.constant 0 : index
    %c2 = arith.constant 2 : index
    %c0_17 = arith.constant 0 : index
    %9 = vector.load %arg3[%c0_16, %c2, %c0_17] : memref<2x10x256xf32, #tpu.memory_space<vmem>>, vector<2x8x256xf32>
    %10 = arith.addf %8, %9 : vector<2x8x256xf32>
    %11 = tpu.iota {dimensions = array<i32: 2>} : vector<1x1x256xi32>
    %c15_i32 = arith.constant 15 : i32
    %12 = vector.broadcast %c15_i32 : i32 to vector<1x1x256xi32>
    %13 = arith.andi %11, %12 : vector<1x1x256xi32>
    %c16_i32 = arith.constant 16 : i32
    %14 = vector.broadcast %c16_i32 : i32 to vector<1x1x256xi32>
    %15 = arith.cmpi sge, %11, %14 : vector<1x1x256xi32>
    %c1_i32 = arith.constant 1 : i32
    %16 = vector.broadcast %c1_i32 : i32 to vector<1x1x256xi32>
    %17 = arith.cmpi sge, %13, %16 : vector<1x1x256xi32>
    %18 = arith.andi %15, %17 : vector<1x1x256xi1>
    %cst_18 = arith.constant -0.0119991675 : f32
    %cst_19 = arith.constant 0.000000e+00 : f32
    %19 = vector.broadcast %cst_18 : f32 to vector<1x1x256xf32>
    %20 = vector.broadcast %cst_19 : f32 to vector<1x1x256xf32>
    %21 = arith.select %18, %19, %20 : vector<1x1x256xi1>, vector<1x1x256xf32>
    %cst_20 = arith.constant 0.00424343068 : f32
    %cst_21 = arith.constant 0.000000e+00 : f32
    %22 = vector.broadcast %cst_20 : f32 to vector<1x1x256xf32>
    %23 = vector.broadcast %cst_21 : f32 to vector<1x1x256xf32>
    %24 = arith.select %15, %22, %23 : vector<1x1x256xi1>, vector<1x1x256xf32>
    %c15_i32_22 = arith.constant 15 : i32
    %25 = vector.broadcast %c15_i32_22 : i32 to vector<1x1x256xi32>
    %26 = arith.cmpi slt, %13, %25 : vector<1x1x256xi32>
    %27 = arith.andi %15, %26 : vector<1x1x256xi1>
    %cst_23 = arith.constant -0.0119991675 : f32
    %cst_24 = arith.constant 0.000000e+00 : f32
    %28 = vector.broadcast %cst_23 : f32 to vector<1x1x256xf32>
    %29 = vector.broadcast %cst_24 : f32 to vector<1x1x256xf32>
    %30 = arith.select %27, %28, %29 : vector<1x1x256xi1>, vector<1x1x256xf32>
    %c1_i32_25 = arith.constant 1 : i32
    %31 = vector.broadcast %c1_i32_25 : i32 to vector<1x1x256xi32>
    %32 = arith.cmpi sge, %13, %31 : vector<1x1x256xi32>
    %cst_26 = arith.constant 0.00424343068 : f32
    %cst_27 = arith.constant 0.000000e+00 : f32
    %33 = vector.broadcast %cst_26 : f32 to vector<1x1x256xf32>
    %34 = vector.broadcast %cst_27 : f32 to vector<1x1x256xf32>
    %35 = arith.select %32, %33, %34 : vector<1x1x256xi1>, vector<1x1x256xf32>
    %c15_i32_28 = arith.constant 15 : i32
    %36 = vector.broadcast %c15_i32_28 : i32 to vector<1x1x256xi32>
    %37 = arith.cmpi slt, %13, %36 : vector<1x1x256xi32>
    %cst_29 = arith.constant 0.00424343068 : f32
    %cst_30 = arith.constant 0.000000e+00 : f32
    %38 = vector.broadcast %cst_29 : f32 to vector<1x1x256xf32>
    %39 = vector.broadcast %cst_30 : f32 to vector<1x1x256xf32>
    %40 = arith.select %37, %38, %39 : vector<1x1x256xi1>, vector<1x1x256xf32>
    %c240_i32 = arith.constant 240 : i32
    %41 = vector.broadcast %c240_i32 : i32 to vector<1x1x256xi32>
    %42 = arith.cmpi slt, %11, %41 : vector<1x1x256xi32>
    %c1_i32_31 = arith.constant 1 : i32
    %43 = vector.broadcast %c1_i32_31 : i32 to vector<1x1x256xi32>
    %44 = arith.cmpi sge, %13, %43 : vector<1x1x256xi32>
    %45 = arith.andi %42, %44 : vector<1x1x256xi1>
    %cst_32 = arith.constant -0.0119991675 : f32
    %cst_33 = arith.constant 0.000000e+00 : f32
    %46 = vector.broadcast %cst_32 : f32 to vector<1x1x256xf32>
    %47 = vector.broadcast %cst_33 : f32 to vector<1x1x256xf32>
    %48 = arith.select %45, %46, %47 : vector<1x1x256xi1>, vector<1x1x256xf32>
    %cst_34 = arith.constant 0.00424343068 : f32
    %cst_35 = arith.constant 0.000000e+00 : f32
    %49 = vector.broadcast %cst_34 : f32 to vector<1x1x256xf32>
    %50 = vector.broadcast %cst_35 : f32 to vector<1x1x256xf32>
    %51 = arith.select %42, %49, %50 : vector<1x1x256xi1>, vector<1x1x256xf32>
    %c15_i32_36 = arith.constant 15 : i32
    %52 = vector.broadcast %c15_i32_36 : i32 to vector<1x1x256xi32>
    %53 = arith.cmpi slt, %13, %52 : vector<1x1x256xi32>
    %54 = arith.andi %42, %53 : vector<1x1x256xi1>
    %cst_37 = arith.constant -0.0119991675 : f32
    %cst_38 = arith.constant 0.000000e+00 : f32
    %55 = vector.broadcast %cst_37 : f32 to vector<1x1x256xf32>
    %56 = vector.broadcast %cst_38 : f32 to vector<1x1x256xf32>
    %57 = arith.select %54, %55, %56 : vector<1x1x256xi1>, vector<1x1x256xf32>
    %c17_i32 = arith.constant 17 : i32
    %58 = tpu.dynamic_rotate %10 by %c17_i32 dim 2 : vector<2x8x256xf32>, i32 -> vector<2x8x256xf32>
    %59 = vector.broadcast %21 : vector<1x1x256xf32> to vector<2x8x256xf32>
    %60 = arith.mulf %59, %58 : vector<2x8x256xf32>
    %c16_i32_39 = arith.constant 16 : i32
    %61 = tpu.dynamic_rotate %10 by %c16_i32_39 dim 2 : vector<2x8x256xf32>, i32 -> vector<2x8x256xf32>
    %62 = vector.broadcast %24 : vector<1x1x256xf32> to vector<2x8x256xf32>
    %63 = arith.mulf %62, %61 : vector<2x8x256xf32>
    %64 = arith.addf %60, %63 : vector<2x8x256xf32>
    %c15_i32_40 = arith.constant 15 : i32
    %65 = tpu.dynamic_rotate %10 by %c15_i32_40 dim 2 : vector<2x8x256xf32>, i32 -> vector<2x8x256xf32>
    %66 = vector.broadcast %30 : vector<1x1x256xf32> to vector<2x8x256xf32>
    %67 = arith.mulf %66, %65 : vector<2x8x256xf32>
    %68 = arith.addf %64, %67 : vector<2x8x256xf32>
    %c1_i32_41 = arith.constant 1 : i32
    %69 = tpu.dynamic_rotate %10 by %c1_i32_41 dim 2 : vector<2x8x256xf32>, i32 -> vector<2x8x256xf32>
    %70 = vector.broadcast %35 : vector<1x1x256xf32> to vector<2x8x256xf32>
    %71 = arith.mulf %70, %69 : vector<2x8x256xf32>
    %72 = arith.addf %68, %71 : vector<2x8x256xf32>
    %cst_42 = arith.constant 0.0310229473 : f32
    %73 = vector.broadcast %cst_42 : f32 to vector<2x8x256xf32>
    %74 = arith.mulf %73, %10 : vector<2x8x256xf32>
    %75 = arith.addf %72, %74 : vector<2x8x256xf32>
    %c255_i32 = arith.constant 255 : i32
    %76 = tpu.dynamic_rotate %10 by %c255_i32 dim 2 : vector<2x8x256xf32>, i32 -> vector<2x8x256xf32>
    %77 = vector.broadcast %40 : vector<1x1x256xf32> to vector<2x8x256xf32>
    %78 = arith.mulf %77, %76 : vector<2x8x256xf32>
    %79 = arith.addf %75, %78 : vector<2x8x256xf32>
    %c241_i32 = arith.constant 241 : i32
    %80 = tpu.dynamic_rotate %10 by %c241_i32 dim 2 : vector<2x8x256xf32>, i32 -> vector<2x8x256xf32>
    %81 = vector.broadcast %48 : vector<1x1x256xf32> to vector<2x8x256xf32>
    %82 = arith.mulf %81, %80 : vector<2x8x256xf32>
    %83 = arith.addf %79, %82 : vector<2x8x256xf32>
    %c240_i32_43 = arith.constant 240 : i32
    %84 = tpu.dynamic_rotate %10 by %c240_i32_43 dim 2 : vector<2x8x256xf32>, i32 -> vector<2x8x256xf32>
    %85 = vector.broadcast %51 : vector<1x1x256xf32> to vector<2x8x256xf32>
    %86 = arith.mulf %85, %84 : vector<2x8x256xf32>
    %87 = arith.addf %83, %86 : vector<2x8x256xf32>
    %c239_i32 = arith.constant 239 : i32
    %88 = tpu.dynamic_rotate %10 by %c239_i32 dim 2 : vector<2x8x256xf32>, i32 -> vector<2x8x256xf32>
    %89 = vector.broadcast %57 : vector<1x1x256xf32> to vector<2x8x256xf32>
    %90 = arith.mulf %89, %88 : vector<2x8x256xf32>
    %91 = arith.addf %87, %90 : vector<2x8x256xf32>
    %c0_44 = arith.constant 0 : index
    %c0_45 = arith.constant 0 : index
    %c0_46 = arith.constant 0 : index
    %92 = vector.load %arg2[%c0_44, %c0_45, %c0_46] : memref<2x8x256xf32, #tpu.memory_space<vmem>>, vector<2x8x256xf32>
    tpu.vector_store %arg2[%c0_44, %c0_45, %c0_46], %91 {strides = array<i32>} : memref<2x8x256xf32, #tpu.memory_space<vmem>>, vector<2x8x256xf32>,
    return
  }
  func.func @transform_0(%arg0: i32) -> (i32, i32, i32) {
    %c0_i32 = arith.constant 0 : i32
    %c0_i32_0 = arith.constant 0 : i32
    %c0_i32_1 = arith.constant 0 : i32
    return %arg0, %c0_i32, %c0_i32_0 : i32, i32, i32
  }
  func.func @transform_1(%arg0: i32) -> (i32, i32, i32) {
    %c0_i32 = arith.constant 0 : i32
    %c0_i32_0 = arith.constant 0 : i32
    %c0_i32_1 = arith.constant 0 : i32
    return %arg0, %c0_i32, %c0_i32_0 : i32, i32, i32
  }
}

</mosaic_0001>

<bundles_post_ra>
// kernel: tpu_custom_call.1
= control target key start
LH: loop header
LB: loop body
LE: loop exit
PB: predicated region body
PF: predicated region fallthrough
CT: control target
= control target key end

     0   :  { %6 = vsyncpa [#allocation4], 0  ;;  %s661_s0 = inlined_call_operand.hbm [shape: f32[2,8,256], index: 0, kind: input, shape index: {}]   ;;  %s662_s1 = inlined_call_operand.hbm [shape: f32[2,8,256], index: 1, kind: output, shape index: {}]  }
   0x1   :  { %7 = vsyncpa [#allocation5], 0  ;;  %s430_s6 = smov [#allocation3]   ;;  %s382_s10 = scalar_lea.hbm %s661_s0, 512 }
   0x2   :  { %s13_s7 = sshll.u32 %s430_s6, 4  ;;  %p383_p0 = scmp.ne.s32.totalorder %s661_s0, %s382_s10  ;;  %s14_s7 = int_to_ptr.vmem [resolvable:$true] %s13_s7 }
   0x3   :  { %p386_p1 = scmp.lt.u32.totalorder %s382_s10, %s661_s0 }
   0x5   :  { %p388_p2 = pnand %p386_p1, %p383_p0 }
   0x7   :  { %391 = shalt.err (!%p388_p2)
}
   0x8   :  { %s392_s15 = scalar_lea.vmem %s14_s7, 512  ;;  %p397_p4 = scmp.lt.s32.totalorder %s14_s7, %s14_s7 }
   0x9   :  { %p393_p3 = scmp.ne.s32.totalorder %s14_s7, %s392_s15  ;;  %p398_p5 = scmp.lt.s32.totalorder %s392_s15, %s392_s15 }
   0xb   :  { %p399_p6 = por %p398_p5, %p397_p4 }
   0xd   :  { %p400_p7 = pnand %p399_p6, %p393_p3 }
   0xf   :  { %403 = shalt.err (!%p400_p7)
}
  0x10   :  { %s431_s16 = smov 256   ;;  %s432_s17 = smov 16  }
  0x11   :  { %19 = dma.hbm_to_vmem [thread:$0]  %s661_s0, 512, %s14_s7, [#allocation4], %s431_s16, %s431_s16, %s432_s17  }
  0x12   :  { %426 = dma.done.wait [#allocation4], 512  }
  0x13   :  { %427 = vsyncadd [#allocation4], 4294966784  ;;  %v23_v0 = vlaneseq  ;;  %v433_v1 = vmov 0.0   ;;  %v39_v2 = vld [vmem:[#allocation3 + $0x8] sm:$0xff]  ;;  %v38_v3 = vld [vmem:[#allocation3] sm:$0xff]  ;;  %vm82_vm1 = vcmask 1046528  }
  0x14   :  { %v41_v4 = vld [vmem:[#allocation3 + $0x18] sm:$0xff]  ;;  %v47_v5 = vrot.slane %v39_v2, 7  ;;  %v46_v6 = vrot.slane %v38_v3, 7  ;;  %v40_v8 = vld [vmem:[#allocation3 + $0x10] sm:$0xff]  ;;  %vm119_vm2 = vcmask 1045504   ;;  %s434_s0 = smov 17  }
  0x15   :  { %vm25_vm0 = vcmp.lt.s32.totalorder %v23_v0, 256  ;;  %v49_v7 = vrot.slane %v41_v4, 7  ;;  %v48_v9 = vrot.slane %v40_v8, 7  ;;  %s435_s20 = smov 15   ;;  %s436_s21 = smov 1   ;;  %v525_v2 = vand.u32 127, %v23_v0 }
  0x16   :  { %27 = vst.msk [vmem:[#allocation2] ss:$8 sm:$0x3] %vm25_vm0, %v433_v1  ;;  %33 = vst.msk [vmem:[#allocation2 + $0x11] ss:$8 sm:$0x3] %vm25_vm0, %v433_v1 }
  0x17   :  { %30 = vst.msk [vmem:[#allocation2 + $0x20] ss:$8 sm:$0x3] %vm25_vm0, %v433_v1  ;;  %36 = vst.msk [vmem:[#allocation2 + $0x31] ss:$8 sm:$0x3] %vm25_vm0, %v433_v1 }
  0x18   :  { %55 = vst [vmem:[#allocation2 + $0x8] sm:$0xfe] %v47_v5  ;;  %57 = vst [vmem:[#allocation2 + $0x18] sm:$0x1] %v47_v5  ;;  %s437_s22 = smov 127   ;;  %s438_s23 = smov 113  }
  0x19   :  { %54 = vst [vmem:[#allocation2] sm:$0xfe] %v46_v6  ;;  %56 = vst [vmem:[#allocation2 + $0x10] sm:$0x1] %v46_v6  ;;  %s439_s24 = smov 112   ;;  %s440_s25 = smov 111  }
  0x1a   :  { %59 = vst [vmem:[#allocation2 + $0x28] sm:$0xfe] %v49_v7  ;;  %61 = vst [vmem:[#allocation2 + $0x38] sm:$0x1] %v49_v7  ;;  %v528_v5 = vadd.s32 128, %v525_v2  ;;  %v143_v6 = vand.u32 15, %v525_v2 }
  0x1b   :  { %58 = vst [vmem:[#allocation2 + $0x20] sm:$0xfe] %v48_v9  ;;  %60 = vst [vmem:[#allocation2 + $0x30] sm:$0x1] %v48_v9  ;;  %vm145_vm3 = vcmp.ge.s32.totalorder %v525_v2, 16  ;;  %vm202_vm10 = vcmp.lt.s32.totalorder %v525_v2, 16 }
  0x1c   :  { %v144_v9 = vand.u32 15, %v528_v5  ;;  %vm533_vm4 = vcmp.ge.s32.totalorder %v143_v6, 1  ;;  %vm537_vm5 = vcmp.lt.s32.totalorder %v143_v6, 15  ;;  %vm185_vm11 = vcmp.lt.s32.totalorder %v525_v2, 17  ;;  %s441_s26 = smov [#allocation6]  }
  0x1d   :  { %vm149_vm6 = vmand %vm145_vm3, %vm533_vm4  ;;  %vm223_vm12 = vcmp.lt.s32.totalorder %v525_v2, 15  ;;  %vm244_vm13 = vcmp.lt.s32.totalorder %v525_v2, 1  ;;  %vm273_vm14 = vcmp.lt.s32.totalorder %v525_v2, 127  ;;  %vm166_vm15 = vcmp.lt.s32.totalorder %v528_v5, 240  ;;  %s358_s27 = sshll.u32 %s441_s26, 4  ;;  %s359_s27 = int_to_ptr.vmem [resolvable:$true] %s358_s27 }
  0x1e   :  { %vm543_vm7 = vcmp.ge.s32.totalorder %v144_v9, 1  ;;  %vm547_vm8 = vcmp.lt.s32.totalorder %v144_v9, 15  ;;  %vm157_vm9 = vmand %vm145_vm3, %vm537_vm5  ;;  %s404_s28 = scalar_lea.vmem %s359_s27, 512  ;;  %p409_p9 = scmp.lt.s32.totalorder %s359_s27, %s359_s27 }
  0x1f   :  { %v63_v10 = vld [vmem:[#allocation2 + $0x8] sm:$0xff]  ;;  %v69_v12 = vld [vmem:[#allocation2 + $0x18] sm:$0x1]  ;;  %vm168_vm0 = vmand %vm166_vm15, %vm543_vm7  ;;  %p405_p8 = scmp.ne.s32.totalorder %s359_s27, %s404_s28  ;;  %p410_p10 = scmp.lt.s32.totalorder %s404_s28, %s404_s28 }
  0x20   :  { %v67_v11 = vld [vmem:[#allocation2 + $0x8] sm:$0xfe]  ;;  %v87_v14 = vrot.slane %v69_v12, 1  ;;  %v106_v16 = vld [vmem:[#allocation2 + $0x18] sm:$0x3]  ;;  %v62_v21 = vld [vmem:[#allocation2] sm:$0xff] }
  0x21   :  { %v86_v13 = vrot.slane %v67_v11, 1  ;;  %v104_v15 = vld [vmem:[#allocation2 + $0x8] sm:$0xfc]  ;;  %v124_v18 = vrot.slane %v106_v16, 2  ;;  %v66_v19 = vld [vmem:[#allocation2] sm:$0xfe]  ;;  %p411_p11 = por %p410_p10, %p409_p9 }
  0x22   :  { %v123_v17 = vrot.slane %v104_v15, 2  ;;  %v68_v22 = vld [vmem:[#allocation2 + $0x10] sm:$0x1]  ;;  %v83_v23 = vrot.slane %v66_v19, 1  ;;  %v103_v24 = vld [vmem:[#allocation2] sm:$0xfc] }
  0x23   :  { %v88_v20 = vsel %vm82_vm1, %v86_v13, %v87_v14  ;;  %v84_v27 = vrot.slane %v68_v22, 1  ;;  %v105_v28 = vld [vmem:[#allocation2 + $0x10] sm:$0x3]  ;;  %v120_v29 = vrot.slane %v103_v24, 2  ;;  %v65_v30 = vld [vmem:[#allocation2 + $0x28] sm:$0xff]  ;;  %v64_v49 = vld [vmem:[#allocation2 + $0x20] sm:$0xff]  ;;  %p412_p12 = pnand %p411_p11, %p405_p8 }
  0x24   :  { %v100_v25 = vadd.f32 %v88_v20, %v63_v10  ;;  %v125_v26 = vsel %vm119_vm2, %v123_v17, %v124_v18  ;;  %v71_v31 = vld [vmem:[#allocation2 + $0x28] sm:$0xfe]  ;;  %v121_v32 = vrot.slane %v105_v28, 2  ;;  %v73_v33 = vld [vmem:[#allocation2 + $0x38] sm:$0x1] }
  0x25   :  { %v92_v34 = vrot.slane %v71_v31, 1  ;;  %v108_v35 = vld [vmem:[#allocation2 + $0x28] sm:$0xfc]  ;;  %v85_v37 = vsel %vm82_vm1, %v83_v23, %v84_v27  ;;  %v93_v38 = vrot.slane %v73_v33, 1  ;;  %v110_v39 = vld [vmem:[#allocation2 + $0x38] sm:$0x3] }
  0x26   :  { %v474_v36 = vadd.f32 %v125_v26, %v100_v25  ;;  %v129_v40 = vrot.slane %v108_v35, 2  ;;  %v70_v41 = vld [vmem:[#allocation2 + $0x20] sm:$0xfe]  ;;  %v99_v42 = vadd.f32 %v85_v37, %v62_v21  ;;  %v122_v43 = vsel %vm119_vm2, %v120_v29, %v121_v32  ;;  %v72_v45 = vld [vmem:[#allocation2 + $0x30] sm:$0x1] }
  0x27   :  { %v130_v44 = vrot.slane %v110_v39, 2  ;;  %v89_v46 = vrot.slane %v70_v41, 1  ;;  %v107_v47 = vld [vmem:[#allocation2 + $0x20] sm:$0xfc]  ;;  %v94_v48 = vsel %vm82_vm1, %v92_v34, %v93_v38  ;;  %v90_v50 = vrot.slane %v72_v45, 1 }
  0x28   :  { %181 = vrot.lane.b32.xlu1 %v474_v36, %s434_s0  ;;  %v109_v51 = vld [vmem:[#allocation2 + $0x30] sm:$0x3]  ;;  %v126_v52 = vrot.slane %v107_v47, 2  ;;  %v480_v53 = vadd.f32 %v122_v43, %v99_v42  ;;  %v102_v54 = vadd.f32 %v94_v48, %v65_v30  ;;  %v151_v16 = vsel %vm149_vm6, -0.0119991675, %v433_v1 }
  0x29   :  { %v131_v55 = vsel %vm119_vm2, %v129_v40, %v130_v44  ;;  %v127_v56 = vrot.slane %v109_v51, 2  ;;  %v91_v57 = vsel %vm82_vm1, %v89_v46, %v90_v50  ;;  %v152_v18 = vsel %vm543_vm7, -0.0119991675, %v433_v1 }
  0x2a   :  { %177 = vrot.lane.b32.xlu0 %v480_v53, %s434_s0  ;;  %v485_v58 = vadd.f32 %v131_v55, %v102_v54  ;;  %v101_v59 = vadd.f32 %v91_v57, %v64_v49  ;;  %v153_v19 = vsel %vm145_vm3, 0.0042434307, %v433_v1  ;;  %v159_v20 = vsel %vm157_vm9, -0.0119991675, %v433_v1  ;;  %vm174_vm3 = vmand %vm166_vm15, %vm547_vm8 }
  0x2b   :  { %v128_v60 = vsel %vm119_vm2, %v126_v52, %v127_v56  ;;  %v160_v21 = vsel %vm547_vm8, -0.0119991675, %v433_v1  ;;  %v161_v23 = vsel %vm533_vm4, 0.0042434307, %v433_v1  ;;  %v162_v26 = vsel %vm543_vm7, 0.0042434307, %v433_v1 }
  0x2c   :  { %183 = vrot.lane.b32.xlu1 %v485_v58, %s434_s0  ;;  %v489_v61 = vadd.f32 %v128_v60, %v101_v59  ;;  %v260_v45 = vmul.f32 0.031022947, %v485_v58  ;;  %v258_v60 = vmul.f32 0.031022947, %v474_v36  ;;  %vm294_vm1 = vcmp.lt.s32.totalorder %v525_v2, 113 }
  0x2d   :  { %vm315_vm2 = vcmp.lt.s32.totalorder %v525_v2, 112  ;;  %v172_v10 = vsel %vm166_vm15, 0.0042434307, %v433_v1 }
  0x2e   :  { %179 = vrot.lane.b32.xlu0 %v489_v61, %s434_s0  ;;  %v259_v44 = vmul.f32 0.031022947, %v489_v61 }
  0x30   :  { %196 = vrot.lane.b32.xlu1 %v489_v61, %s432_s17 }
  0x32   :  { %194 = vrot.lane.b32.xlu0 %v480_v53, %s432_s17 }
  0x34   :  { %200 = vrot.lane.b32.xlu1 %v485_v58, %s432_s17 }
  0x36   :  { %198 = vrot.lane.b32.xlu0 %v474_v36, %s432_s17 }
  0x38   :  { %217 = vrot.lane.b32.xlu1 %v489_v61, %s435_s20 }
  0x3a   :  { %215 = vrot.lane.b32.xlu0 %v480_v53, %s435_s20 }
  0x3c   :  { %221 = vrot.lane.b32.xlu1 %v485_v58, %s435_s20 }
  0x3e   :  { %219 = vrot.lane.b32.xlu0 %v474_v36, %s435_s20 }
  0x40   :  { %238 = vrot.lane.b32.xlu1 %v489_v61, %s436_s21 }
  0x42   :  { %236 = vrot.lane.b32.xlu0 %v480_v53, %s436_s21 }
  0x44   :  { %242 = vrot.lane.b32.xlu1 %v485_v58, %s436_s21 }
  0x46   :  { %240 = vrot.lane.b32.xlu0 %v474_v36, %s436_s21 }
  0x48   :  { %267 = vrot.lane.b32.xlu1 %v489_v61, %s437_s22 }
  0x4a   :  { %265 = vrot.lane.b32.xlu0 %v480_v53, %s437_s22 }
  0x4c   :  { %271 = vrot.lane.b32.xlu1 %v485_v58, %s437_s22 }
  0x4e   :  { %269 = vrot.lane.b32.xlu0 %v474_v36, %s437_s22 }
  0x50   :  { %288 = vrot.lane.b32.xlu1 %v489_v61, %s438_s23 }
  0x52   :  { %286 = vrot.lane.b32.xlu0 %v480_v53, %s438_s23 }
  0x54   :  { %292 = vrot.lane.b32.xlu1 %v485_v58, %s438_s23 }
  0x56   :  { %290 = vrot.lane.b32.xlu0 %v474_v36, %s438_s23 }
  0x58   :  { %309 = vrot.lane.b32.xlu1 %v489_v61, %s439_s24 }
  0x5a   :  { %307 = vrot.lane.b32.xlu0 %v480_v53, %s439_s24 }
  0x5c   :  { %313 = vrot.lane.b32.xlu1 %v485_v58, %s439_s24 }
  0x5e   :  { %311 = vrot.lane.b32.xlu0 %v474_v36, %s439_s24 }
  0x60   :  { %330 = vrot.lane.b32.xlu1 %v489_v61, %s440_s25 }
  0x62   :  { %328 = vrot.lane.b32.xlu0 %v480_v53, %s440_s25 }
  0x64   :  { %334 = vrot.lane.b32.xlu1 %v485_v58, %s440_s25 }
  0x66   :  { %332 = vrot.lane.b32.xlu0 %v474_v36, %s440_s25 }
  0x9a   :  { %v182_v62 = vpop.permute.xlu1 %181 }
  0x9c   :  { %v178_v63 = vpop.permute.xlu0 %177 }
  0x9d   :  { %v186_v27 = vsel %vm185_vm11, %v178_v63, %v182_v62  ;;  %v188_v28 = vsel %vm185_vm11, %v182_v62, %v178_v63  ;;  %v257_v62 = vmul.f32 0.031022947, %v480_v53 }
  0x9e   :  { %v184_v3 = vpop.permute.xlu1 %183  ;;  %v190_v51 = vmul.f32 %v188_v28, %v151_v16  ;;  %v191_v52 = vmul.f32 %v186_v27, %v152_v18  ;;  %v163_v27 = vsel %vm537_vm5, 0.0042434307, %v433_v1  ;;  %v164_v28 = vsel %vm547_vm8, 0.0042434307, %v433_v1 }
  0xa0   :  { %v180_v4 = vpop.permute.xlu0 %179 }
  0xa1   :  { %v187_v32 = vsel %vm185_vm11, %v180_v4, %v184_v3  ;;  %v189_v33 = vsel %vm185_vm11, %v184_v3, %v180_v4 }
  0xa2   :  { %v197_v7 = vpop.permute.xlu1 %196  ;;  %v192_v46 = vmul.f32 %v189_v33, %v151_v16  ;;  %v193_v47 = vmul.f32 %v187_v32, %v152_v18 }
  0xa4   :  { %v195_v8 = vpop.permute.xlu0 %194 }
  0xa6   :  { %v201_v11 = vpop.permute.xlu1 %200 }
  0xa7   :  { %v204_v24 = vsel %vm202_vm10, %v197_v7, %v201_v11  ;;  %v206_v25 = vsel %vm202_vm10, %v201_v11, %v197_v7 }
  0xa8   :  { %v199_v0 = vpop.permute.xlu0 %198  ;;  %v209_v37 = vmul.f32 %v206_v25, %v153_v19  ;;  %v210_v38 = vmul.f32 0.0042434307, %v204_v24 }
  0xa9   :  { %v203_v29 = vsel %vm202_vm10, %v195_v8, %v199_v0  ;;  %v205_v30 = vsel %vm202_vm10, %v199_v0, %v195_v8 }
  0xaa   :  { %v218_v14 = vpop.permute.xlu1 %217  ;;  %v207_v42 = vmul.f32 %v205_v30, %v153_v19  ;;  %v208_v43 = vmul.f32 0.0042434307, %v203_v29  ;;  %v213_v56 = vadd.f32 %v209_v37, %v192_v46  ;;  %v214_v57 = vadd.f32 %v210_v38, %v193_v47 }
  0xab   :  { %v169_v46 = vsel %vm533_vm4, -0.0119991675, %v433_v1  ;;  %v170_v47 = vsel %vm168_vm0, -0.0119991675, %v433_v1  ;;  %vm336_vm4 = vcmp.lt.s32.totalorder %v525_v2, 111 }
  0xac   :  { %v216_v17 = vpop.permute.xlu0 %215  ;;  %v211_v63 = vadd.f32 %v207_v42, %v190_v51  ;;  %v212_v61 = vadd.f32 %v208_v43, %v191_v52 }
  0xae   :  { %v222_v22 = vpop.permute.xlu1 %221 }
  0xaf   :  { %v225_v34 = vsel %vm223_vm12, %v218_v14, %v222_v22  ;;  %v227_v35 = vsel %vm223_vm12, %v222_v22, %v218_v14 }
  0xb0   :  { %v220_v31 = vpop.permute.xlu0 %219  ;;  %v230_v48 = vmul.f32 %v227_v35, %v159_v20  ;;  %v231_v49 = vmul.f32 %v225_v34, %v160_v21 }
  0xb1   :  { %v224_v39 = vsel %vm223_vm12, %v216_v17, %v220_v31  ;;  %v226_v40 = vsel %vm223_vm12, %v220_v31, %v216_v17 }
  0xb2   :  { %v239_v41 = vpop.permute.xlu1 %238  ;;  %v228_v54 = vmul.f32 %v226_v40, %v159_v20  ;;  %v229_v55 = vmul.f32 %v224_v39, %v160_v21  ;;  %v234_v4 = vadd.f32 %v230_v48, %v213_v56  ;;  %v235_v6 = vadd.f32 %v231_v49, %v214_v57 }
  0xb4   :  { %v237_v50 = vpop.permute.xlu0 %236  ;;  %v232_v11 = vadd.f32 %v228_v54, %v211_v63  ;;  %v233_v0 = vadd.f32 %v229_v55, %v212_v61 }
  0xb6   :  { %v243_v59 = vpop.permute.xlu1 %242 }
  0xb7   :  { %v246_v58 = vsel %vm244_vm13, %v239_v41, %v243_v59  ;;  %v248_v3 = vsel %vm244_vm13, %v243_v59, %v239_v41 }
  0xb8   :  { %v251_v7 = vmul.f32 %v248_v3, %v161_v23  ;;  %v252_v8 = vmul.f32 %v246_v58, %v162_v26  ;;  %v241_v9 = vpop.permute.xlu0 %240 }
  0xb9   :  { %v245_v36 = vsel %vm244_vm13, %v237_v50, %v241_v9  ;;  %v247_v53 = vsel %vm244_vm13, %v241_v9, %v237_v50 }
  0xba   :  { %v255_v14 = vadd.f32 %v251_v7, %v234_v4  ;;  %v256_v16 = vadd.f32 %v252_v8, %v235_v6  ;;  %v249_v17 = vmul.f32 %v247_v53, %v161_v23  ;;  %v250_v18 = vmul.f32 %v245_v36, %v162_v26  ;;  %v268_v19 = vpop.permute.xlu1 %267 }
  0xbc   :  { %v253_v20 = vadd.f32 %v249_v17, %v232_v11  ;;  %v254_v21 = vadd.f32 %v250_v18, %v233_v0  ;;  %v266_v22 = vpop.permute.xlu0 %265  ;;  %v263_v24 = vadd.f32 %v259_v44, %v255_v14  ;;  %v264_v25 = vadd.f32 %v260_v45, %v256_v16 }
  0xbe   :  { %v272_v29 = vpop.permute.xlu1 %271  ;;  %v262_v30 = vadd.f32 %v258_v60, %v254_v21  ;;  %v261_v23 = vadd.f32 %v257_v62, %v253_v20  ;;  %v175_v21 = vsel %vm537_vm5, -0.0119991675, %v433_v1 }
  0xbf   :  { %v275_v26 = vsel %vm273_vm14, %v268_v19, %v272_v29  ;;  %v277_v31 = vsel %vm273_vm14, %v272_v29, %v268_v19 }
  0xc0   :  { %v280_v32 = vmul.f32 %v275_v26, %v163_v27  ;;  %v281_v33 = vmul.f32 %v277_v31, %v164_v28  ;;  %v270_v34 = vpop.permute.xlu0 %269 }
  0xc1   :  { %v274_v35 = vsel %vm273_vm14, %v266_v22, %v270_v34  ;;  %v276_v37 = vsel %vm273_vm14, %v270_v34, %v266_v22  ;;  %v176_v22 = vsel %vm174_vm3, -0.0119991675, %v433_v1 }
  0xc2   :  { %v284_v38 = vadd.f32 %v280_v32, %v263_v24  ;;  %v285_v39 = vadd.f32 %v281_v33, %v264_v25  ;;  %v278_v40 = vmul.f32 %v274_v35, %v163_v27  ;;  %v279_v41 = vmul.f32 %v276_v37, %v164_v28  ;;  %v289_v42 = vpop.permute.xlu1 %288 }
  0xc4   :  { %v282_v43 = vadd.f32 %v278_v40, %v261_v23  ;;  %v283_v44 = vadd.f32 %v279_v41, %v262_v30  ;;  %v287_v45 = vpop.permute.xlu0 %286 }
  0xc6   :  { %v293_v48 = vpop.permute.xlu1 %292 }
  0xc7   :  { %v296_v49 = vsel %vm294_vm1, %v289_v42, %v293_v48  ;;  %v298_v50 = vsel %vm294_vm1, %v293_v48, %v289_v42 }
  0xc8   :  { %v301_v51 = vmul.f32 %v296_v49, %v169_v46  ;;  %v302_v52 = vmul.f32 %v298_v50, %v170_v47  ;;  %v291_v13 = vpop.permute.xlu0 %290 }
  0xc9   :  { %v295_v54 = vsel %vm294_vm1, %v287_v45, %v291_v13  ;;  %v297_v55 = vsel %vm294_vm1, %v291_v13, %v287_v45 }
  0xca   :  { %v305_v56 = vadd.f32 %v301_v51, %v284_v38  ;;  %v306_v57 = vadd.f32 %v302_v52, %v285_v39  ;;  %v299_v59 = vmul.f32 %v295_v54, %v169_v46  ;;  %v300_v60 = vmul.f32 %v297_v55, %v170_v47  ;;  %v310_v62 = vpop.permute.xlu1 %309 }
  0xcc   :  { %v303_v63 = vadd.f32 %v299_v59, %v282_v43  ;;  %v304_v61 = vadd.f32 %v300_v60, %v283_v44  ;;  %v308_v58 = vpop.permute.xlu0 %307 }
  0xce   :  { %v314_v3 = vpop.permute.xlu1 %313 }
  0xcf   :  { %v317_v4 = vsel %vm315_vm2, %v310_v62, %v314_v3  ;;  %v319_v6 = vsel %vm315_vm2, %v314_v3, %v310_v62 }
  0xd0   :  { %v322_v7 = vmul.f32 0.0042434307, %v317_v4  ;;  %v323_v8 = vmul.f32 %v319_v6, %v172_v10  ;;  %v312_v9 = vpop.permute.xlu0 %311 }
  0xd1   :  { %v316_v11 = vsel %vm315_vm2, %v308_v58, %v312_v9  ;;  %v318_v0 = vsel %vm315_vm2, %v312_v9, %v308_v58 }
  0xd2   :  { %v326_v36 = vadd.f32 %v322_v7, %v305_v56  ;;  %v327_v53 = vadd.f32 %v323_v8, %v306_v57  ;;  %v320_v14 = vmul.f32 0.0042434307, %v316_v11  ;;  %v321_v16 = vmul.f32 %v318_v0, %v172_v10  ;;  %v331_v17 = vpop.permute.xlu1 %330 }
  0xd4   :  { %v324_v18 = vadd.f32 %v320_v14, %v303_v63  ;;  %v325_v19 = vadd.f32 %v321_v16, %v304_v61  ;;  %v329_v20 = vpop.permute.xlu0 %328 }
  0xd6   :  { %v335_v24 = vpop.permute.xlu1 %334 }
  0xd7   :  { %v338_v25 = vsel %vm336_vm4, %v331_v17, %v335_v24  ;;  %v340_v27 = vsel %vm336_vm4, %v335_v24, %v331_v17 }
  0xd8   :  { %v343_v28 = vmul.f32 %v338_v25, %v175_v21  ;;  %v344_v29 = vmul.f32 %v340_v27, %v176_v22  ;;  %v333_v15 = vpop.permute.xlu0 %332 }
  0xd9   :  { %v337_v30 = vsel %vm336_vm4, %v329_v20, %v333_v15  ;;  %v339_v5 = vsel %vm336_vm4, %v333_v15, %v329_v20 }
  0xda   :  { %v347_v23 = vadd.f32 %v343_v28, %v326_v36  ;;  %v348_v26 = vadd.f32 %v344_v29, %v327_v53  ;;  %v341_v31 = vmul.f32 %v337_v30, %v175_v21  ;;  %v342_v2 = vmul.f32 %v339_v5, %v176_v22 }
  0xdc   :  { %351 = vst [vmem:[#allocation6 + $0x10] sm:$0xff] %v347_v23  ;;  %352 = vst [vmem:[#allocation6 + $0x18] sm:$0xff] %v348_v26  ;;  %v345_v12 = vadd.f32 %v341_v31, %v324_v18  ;;  %v346_v32 = vadd.f32 %v342_v2, %v325_v19 }
  0xde   :  { %349 = vst [vmem:[#allocation6] sm:$0xff] %v345_v12  ;;  %350 = vst [vmem:[#allocation6 + $0x8] sm:$0xff] %v346_v32 }
  0xdf   :  { %415 = shalt.err (!%p412_p12)
}
  0xe0   :  { %s416_s2 = scalar_lea.hbm %s662_s1, 512 }
  0xe1   :  { %p417_p13 = scmp.ne.s32.totalorder %s662_s1, %s416_s2  ;;  %p420_p0 = scmp.lt.u32.totalorder %s416_s2, %s662_s1 }
  0xe3   :  { %p422_p1 = pnand %p420_p0, %p417_p13 }
  0xe5   :  { %425 = shalt.err (!%p422_p1)
}
  0xe6   :  { %364 = dma.vmem_to_hbm [thread:$0]  %s359_s27, 512, %s662_s1, [#allocation5], %s431_s16, %s431_s16, %s432_s17  }
  0xe7   :  { %428 = dma.done.wait [#allocation5], 512  }
  0xe8   :  { %429 = vsyncadd [#allocation5], 4294966784 }
  0xe9   :  { %368 = vsyncpa [#allocation4], 1 }
  0xea   :  { %369 = vsyncpa [#allocation5], 1 }

</bundles_post_ra>
